<compile_context>
chip_gen: v5e
topology: v5e:2x2
jax: 0.10.0
libtpu: 0.0.40
codegen_flags: <defaults>
</compile_context>

<pallas_src>
import functools
import math

import jax
import jax.numpy as jnp
from jax.experimental import pallas as pl
from jax.experimental.pallas import tpu as pltpu

# ------------------------- module hyper-parameters --------------------------
IN_DIM = 16
OUT_DIM = 32
BATCH = 2
SEQ = 8

_INV_SQRT2 = 0.7071067811865476


def _gelu_exact(x):
    # PyTorch nn.GELU() default = exact erf formulation.
    return 0.5 * x * (1.0 + jax.lax.erf(x * _INV_SQRT2))


# ------------------------------ Pallas kernel -------------------------------
def _encoder_block_kernel(x_ref, p_ref, o_ref, *, in_dim, hid, out_dim):
    """Fused Linear -> GELU -> Linear -> GELU -> Linear.

    p_ref: (in_dim + 2*hid + pad, hid) row-packed [W1p; W2p; W3p; b1; b2; b3; 0],
           zero-padded so every matmul is hid lanes wide (numerically exact).
    """
    x = x_ref[...]                                   # (R, in_dim)

    r1 = in_dim                                      # end of W1 rows (sublane-aligned)
    r2 = r1 + hid                                    # end of W2 rows
    r3 = r2 + hid                                    # end of W3 rows

    w1 = p_ref[0:r1, :]                              # (in_dim, hid)
    w2 = p_ref[r1:r2, :]                             # (hid,    hid)
    w3 = p_ref[r2:r3, :]                             # (hid,    hid)
    b1 = p_ref[r3 + 0:r3 + 1, :]                     # (1, hid)
    b2 = p_ref[r3 + 1:r3 + 2, :]                     # (1, hid)
    b3 = p_ref[r3 + 2:r3 + 3, :]                     # (1, hid)

    h = jnp.dot(x, w1, preferred_element_type=jnp.float32) + b1
    h = _gelu_exact(h)
    h = jnp.dot(h, w2, preferred_element_type=jnp.float32) + b2
    h = _gelu_exact(h)
    y = jnp.dot(h, w3, preferred_element_type=jnp.float32) + b3

    o_ref[...] = y[:, :out_dim]


def encoder_block(x, packed):
    """x: (..., in_dim) float32 -> (..., out_dim) float32."""
    in_dim = packed["in_dim"]
    hid = packed["hid"]
    out_dim = packed["out_dim"]

    lead = x.shape[:-1]
    x2 = x.reshape(-1, in_dim)
    rows = x2.shape[0]

    kernel = functools.partial(
        _encoder_block_kernel, in_dim=in_dim, hid=hid, out_dim=out_dim)

    out = pl.pallas_call(
        kernel,
        out_shape=jax.ShapeDtypeStruct((rows, out_dim), jnp.float32),
        in_specs=[pl.BlockSpec(memory_space=pltpu.MemorySpace.VMEM)] * 2,
        out_specs=pl.BlockSpec(memory_space=pltpu.MemorySpace.VMEM),
    )(x2, packed["p"])

    return out.reshape(*lead, out_dim)


# --------------------------- parameter handling ------------------------------
def _linear_init(key, din, dout):
    """PyTorch nn.Linear default init; weight stored transposed as (din, dout)."""
    kw, kb = jax.random.split(key)
    bound = 1.0 / math.sqrt(din)
    w = jax.random.uniform(kw, (din, dout), jnp.float32, -bound, bound)
    b = jax.random.uniform(kb, (dout,), jnp.float32, -bound, bound)
    return w, b


def init_params(key, in_dim, out_dim):
    k1, k2, k3 = jax.random.split(key, 3)
    w1, b1 = _linear_init(k1, in_dim, in_dim)
    w2, b2 = _linear_init(k2, in_dim, in_dim)
    w3, b3 = _linear_init(k3, in_dim, out_dim)
    return dict(w1=w1, b1=b1, w2=w2, b2=b2, w3=w3, b3=b3)


def pack_params(p, in_dim, out_dim):
    """Pack all 6 parameter tensors into one zero-padded, row-aligned slab."""
    hid = max(in_dim, out_dim)                       # padded lane width (32 here)
    w1p = jnp.zeros((in_dim, hid), jnp.float32).at[:, :in_dim].set(p["w1"])
    w2p = jnp.zeros((hid, hid), jnp.float32).at[:in_dim, :in_dim].set(p["w2"])
    w3p = jnp.zeros((hid, hid), jnp.float32).at[:in_dim, :out_dim].set(p["w3"])

    bias_rows = jnp.zeros((3, hid), jnp.float32)
    bias_rows = (bias_rows.at[0, :in_dim].set(p["b1"])
                          .at[1, :in_dim].set(p["b2"])
                          .at[2, :out_dim].set(p["b3"]))

    slab = jnp.concatenate([w1p, w2p, w3p, bias_rows], axis=0)
    # Pad total row count to a multiple of 8 (full sublane tiles in VMEM).
    total = slab.shape[0]
    pad = (-total) % 8
    if pad:
        slab = jnp.concatenate([slab, jnp.zeros((pad, hid), jnp.float32)], axis=0)

    return dict(p=slab, in_dim=in_dim, hid=hid, out_dim=out_dim)


# ------------------------- pure-JAX reference (check) ------------------------
def ref_encoder_block(x, p):
    h = _gelu_exact(x @ p["w1"] + p["b1"])
    h = _gelu_exact(h @ p["w2"] + p["b2"])
    return h @ p["w3"] + p["b3"]


# ----------------------------------- main ------------------------------------
if __name__ == "__main__":
    key = jax.random.PRNGKey(0)
    pkey, xkey = jax.random.split(key)

    params = init_params(pkey, IN_DIM, OUT_DIM)
    packed = pack_params(params, IN_DIM, OUT_DIM)

    x = jax.random.normal(xkey, (BATCH, SEQ, IN_DIM), jnp.float32)

    out = encoder_block(x, packed)
    out = jax.block_until_ready(out)

    ref = ref_encoder_block(x, params)
    assert out.shape == (BATCH, SEQ, OUT_DIM), out.shape
    assert jnp.allclose(out, ref, atol=1e-3, rtol=1e-3), float(
        jnp.max(jnp.abs(out - ref)))
    print("KERNEL_OK")
</pallas_src>

<mosaic_0001>
module attributes {stable_mosaic.version = 11 : i64} {
  func.func @_encoder_block_kernel(%arg0: memref<16x16xf32, #tpu.memory_space<vmem>>, %arg1: memref<88x32xf32, #tpu.memory_space<vmem>>, %arg2: memref<16x32xf32, #tpu.memory_space<vmem>>) attributes {dimension_semantics = [], scalar_prefetch = 0 : i64, scratch_operands = 0 : i64, tpu.core_type = #tpu.core_type<tc>} {
    %c0 = arith.constant 0 : index
    %c0_0 = arith.constant 0 : index
    %0 = vector.load %arg0[%c0, %c0_0] : memref<16x16xf32, #tpu.memory_space<vmem>>, vector<16x16xf32>
    %c0_1 = arith.constant 0 : index
    %c0_2 = arith.constant 0 : index
    %1 = vector.load %arg1[%c0_1, %c0_2] : memref<88x32xf32, #tpu.memory_space<vmem>>, vector<16x32xf32>
    %c16 = arith.constant 16 : index
    %c0_3 = arith.constant 0 : index
    %2 = vector.load %arg1[%c16, %c0_3] : memref<88x32xf32, #tpu.memory_space<vmem>>, vector<32x32xf32>
    %c48 = arith.constant 48 : index
    %c0_4 = arith.constant 0 : index
    %3 = vector.load %arg1[%c48, %c0_4] : memref<88x32xf32, #tpu.memory_space<vmem>>, vector<32x32xf32>
    %c80 = arith.constant 80 : index
    %c0_5 = arith.constant 0 : index
    %4 = vector.load %arg1[%c80, %c0_5] : memref<88x32xf32, #tpu.memory_space<vmem>>, vector<1x32xf32>
    %c81 = arith.constant 81 : index
    %c0_6 = arith.constant 0 : index
    %5 = vector.load %arg1[%c81, %c0_6] : memref<88x32xf32, #tpu.memory_space<vmem>>, vector<1x32xf32>
    %c82 = arith.constant 82 : index
    %c0_7 = arith.constant 0 : index
    %6 = vector.load %arg1[%c82, %c0_7] : memref<88x32xf32, #tpu.memory_space<vmem>>, vector<1x32xf32>
    %cst = arith.constant dense<0.000000e+00> : vector<16x32xf32>
    %7 = tpu.matmul %0, %1, %cst {dimension_numbers = #tpu.dot_dimension_numbers<[1], [0], [0], [1], [0, 0, 1, 1], [], []>} : vector<16x16xf32>, vector<16x32xf32>, vector<16x32xf32> -> vector<16x32xf32>
    %8 = vector.broadcast %4 : vector<1x32xf32> to vector<16x32xf32>
    %9 = arith.addf %7, %8 : vector<16x32xf32>
    %cst_8 = arith.constant 5.000000e-01 : f32
    %10 = vector.broadcast %cst_8 : f32 to vector<16x32xf32>
    %11 = arith.mulf %10, %9 : vector<16x32xf32>
    %cst_9 = arith.constant 0.707106769 : f32
    %12 = vector.broadcast %cst_9 : f32 to vector<16x32xf32>
    %13 = arith.mulf %9, %12 : vector<16x32xf32>
    %14 = math.erf %13 : vector<16x32xf32>
    %cst_10 = arith.constant 1.000000e+00 : f32
    %15 = vector.broadcast %cst_10 : f32 to vector<16x32xf32>
    %16 = arith.addf %15, %14 : vector<16x32xf32>
    %17 = arith.mulf %11, %16 : vector<16x32xf32>
    %cst_11 = arith.constant dense<0.000000e+00> : vector<16x32xf32>
    %18 = tpu.matmul %17, %2, %cst_11 {dimension_numbers = #tpu.dot_dimension_numbers<[1], [0], [0], [1], [0, 0, 1, 1], [], []>} : vector<16x32xf32>, vector<32x32xf32>, vector<16x32xf32> -> vector<16x32xf32>
    %19 = vector.broadcast %5 : vector<1x32xf32> to vector<16x32xf32>
    %20 = arith.addf %18, %19 : vector<16x32xf32>
    %cst_12 = arith.constant 5.000000e-01 : f32
    %21 = vector.broadcast %cst_12 : f32 to vector<16x32xf32>
    %22 = arith.mulf %21, %20 : vector<16x32xf32>
    %cst_13 = arith.constant 0.707106769 : f32
    %23 = vector.broadcast %cst_13 : f32 to vector<16x32xf32>
    %24 = arith.mulf %20, %23 : vector<16x32xf32>
    %25 = math.erf %24 : vector<16x32xf32>
    %cst_14 = arith.constant 1.000000e+00 : f32
    %26 = vector.broadcast %cst_14 : f32 to vector<16x32xf32>
    %27 = arith.addf %26, %25 : vector<16x32xf32>
    %28 = arith.mulf %22, %27 : vector<16x32xf32>
    %cst_15 = arith.constant dense<0.000000e+00> : vector<16x32xf32>
    %29 = tpu.matmul %28, %3, %cst_15 {dimension_numbers = #tpu.dot_dimension_numbers<[1], [0], [0], [1], [0, 0, 1, 1], [], []>} : vector<16x32xf32>, vector<32x32xf32>, vector<16x32xf32> -> vector<16x32xf32>
    %30 = vector.broadcast %6 : vector<1x32xf32> to vector<16x32xf32>
    %31 = arith.addf %29, %30 : vector<16x32xf32>
    %c0_16 = arith.constant 0 : index
    %c0_17 = arith.constant 0 : index
    %32 = vector.load %arg2[%c0_16, %c0_17] : memref<16x32xf32, #tpu.memory_space<vmem>>, vector<16x32xf32>
    tpu.vector_store %arg2[%c0_16, %c0_17], %31 {strides = array<i32>} : memref<16x32xf32, #tpu.memory_space<vmem>>, vector<16x32xf32>,
    return
  }
}

</mosaic_0001>

<bundles_post_ra>
// kernel: tpu_custom_call.1
= control target key start
LH: loop header
LB: loop body
LE: loop exit
PB: predicated region body
PF: predicated region fallthrough
CT: control target
= control target key end

     0   :  { %vm28_vm0 = vcmask 130048   ;;  %s477_s0 = inlined_call_operand.vmem [shape: f32[16,16], index: 0, kind: input, shape index: {}]   ;;  %s478_s1 = inlined_call_operand.vmem [shape: f32[88,32], index: 1, kind: input, shape index: {}]   ;;  %s479_s2 = inlined_call_operand.hbm [shape: f32[16,32], index: 2, kind: output, shape index: {}]  }
   0x1   :  { %v15_v0 = vld [vmem:[%s478_s1 + $0x8] sm:$0xff]  ;;  %v14_v1 = vld [vmem:[%s478_s1] sm:$0xff] }
   0x2   :  { %49 = vmatpush.msra.mxu0 %v15_v0  ;;  %v12_v2 = vld [vmem:[%s477_s0] sm:$0xff] }
   0x3   :  { %7 = vsyncpa [#allocation3], 0  ;;  %v13_v3 = vld [vmem:[%s477_s0 + $0x8] sm:$0xff]  ;;  %v332_v4 = vld [vmem:[%s478_s1 + $0x50] ss:$0 sm:$0xff]  ;;  %vm147_vm7 = vcmask 261120  }
   0x4   :  { %50 = vmatpush.msra.mxu0 %v14_v1  ;;  %v19_v23 = vld [vmem:[%s478_s1 + $0x28] sm:$0xff]  ;;  %v18_v27 = vld [vmem:[%s478_s1 + $0x20] sm:$0xff]  ;;  %v17_v32 = vld [vmem:[%s478_s1 + $0x18] sm:$0xff]  ;;  %s369_s10 = smov [#allocation2]   ;;  %s303_s14 = sshll.u32 %s479_s2, 4  ;;  %s304_s14 = int_to_ptr.hbm [resolvable:$true] %s303_s14 }
   0x5   :  { %315 = vmatmul.msk.f32.vlgmr.msra.gmra.mxu0 %vm28_vm0, %v12_v2  ;;  %166 = vmatpush.msra.mxu1 %v19_v23  ;;  %v16_v36 = vld [vmem:[%s478_s1 + $0x10] sm:$0xff]  ;;  %s301_s11 = sshll.u32 %s369_s10, 4  ;;  %s370_s15 = smov 128   ;;  %s302_s11 = int_to_ptr.vmem [resolvable:$true] %s301_s11 }
   0x6   :  { %325 = vmatpush.msra.mxu3 %v19_v23  ;;  %s371_s16 = smov 8  }
   0x7   :  { %167 = vmatpush.msra.mxu1 %v18_v27 }
   0x8   :  { %326 = vmatpush.msra.mxu3 %v18_v27 }
   0x9   :  { %168 = vmatpush.msra.mxu1 %v17_v32 }
   0xa   :  { %327 = vmatpush.msra.mxu3 %v17_v32 }
   0xb   :  { %169 = vmatpush.msra.mxu1 %v16_v36 }
   0xc   :  { %328 = vmatpush.msra.mxu3 %v16_v36 }
   0xd   :  { %316 = vmatmul.msk.f32.gmra.mxu0 %vm28_vm0, %v13_v3 }
  0x82   :  { %v52_v5 = vpop.f32.mrf.mxu0 }
  0x83   :  { %v402_v6 = vadd.f32 %v332_v4, %v52_v5 }
  0x85   :  { %v405_v7 = vmul.f32 0.70710677, %v402_v6 }
  0x87   :  { %v62_v8 = vmul.f32 %v405_v7, %v405_v7 }
  0x89   :  { %v63_v9 = vmin.f32 %v62_v8, 16.0 }
  0x8a   :  { %v55_v10 = vpop.f32.mrf.mxu0 }
  0x8b   :  { %v64_v11 = vmul.f32 2.1237322e-06, %v63_v9  ;;  %v75_v12 = vmul.f32 3.8918573e-05, %v63_v9  ;;  %v409_v13 = vadd.f32 %v332_v4, %v55_v10 }
  0x8d   :  { %v65_v14 = vadd.f32 0.00028619796, %v64_v11  ;;  %v76_v15 = vadd.f32 0.001143296, %v75_v12  ;;  %v412_v16 = vmul.f32 0.70710677, %v409_v13 }
  0x8e   :  { %v59_v27 = vmul.f32 0.5, %v409_v13 }
  0x8f   :  { %v66_v17 = vmul.f32 %v65_v14, %v63_v9  ;;  %v77_v18 = vmul.f32 %v76_v15, %v63_v9  ;;  %v102_v19 = vmul.f32 %v412_v16, %v412_v16 }
  0x91   :  { %v78_v20 = vadd.f32 0.014752088, %v77_v18  ;;  %v67_v21 = vadd.f32 0.0036580483, %v66_v17  ;;  %v103_v22 = vmin.f32 %v102_v19, 16.0  ;;  %v58_v18 = vmul.f32 0.5, %v402_v6 }
  0x93   :  { %v79_v24 = vmul.f32 %v78_v20, %v63_v9  ;;  %v104_v25 = vmul.f32 2.1237322e-06, %v103_v22  ;;  %v115_v26 = vmul.f32 3.8918573e-05, %v103_v22  ;;  %v68_v29 = vmul.f32 %v67_v21, %v63_v9 }
  0x95   :  { %v80_v28 = vadd.f32 0.112945676, %v79_v24  ;;  %v105_v30 = vadd.f32 0.00028619796, %v104_v25  ;;  %v116_v31 = vadd.f32 0.001143296, %v115_v26 }
  0x96   :  { %v69_v38 = vadd.f32 0.05243302, %v68_v29  ;;  %v333_v29 = vld [vmem:[%s478_s1 + $0x51] ss:$0 sm:$0xff] }
  0x97   :  { %v81_v33 = vmul.f32 %v80_v28, %v63_v9  ;;  %v106_v34 = vmul.f32 %v105_v30, %v103_v22  ;;  %v117_v35 = vmul.f32 %v116_v31, %v103_v22 }
  0x98   :  { %v70_v44 = vmul.f32 %v69_v38, %v63_v9 }
  0x99   :  { %v82_v37 = vadd.f32 0.4994258, %v81_v33  ;;  %v118_v39 = vadd.f32 0.014752088, %v117_v35  ;;  %v107_v41 = vadd.f32 0.0036580483, %v106_v34 }
  0x9a   :  { %v71_v48 = vadd.f32 0.18741608, %v70_v44 }
  0x9b   :  { %v83_v40 = vmul.f32 %v82_v37, %v63_v9  ;;  %v119_v42 = vmul.f32 %v118_v39, %v103_v22  ;;  %v108_v46 = vmul.f32 %v107_v41, %v103_v22 }
  0x9c   :  { %v72_v53 = vmul.f32 %v71_v48, %v63_v9 }
  0x9d   :  { %v84_v43 = vadd.f32 1.0, %v83_v40  ;;  %v120_v45 = vadd.f32 0.112945676, %v119_v42  ;;  %v109_v50 = vadd.f32 0.05243302, %v108_v46  ;;  %v22_v46 = vld [vmem:[%s478_s1 + $0x40] sm:$0xff] }
  0x9e   :  { %v73_v59 = vadd.f32 1.1283791, %v72_v53  ;;  %v20_v53 = vld [vmem:[%s478_s1 + $0x30] sm:$0xff] }
  0x9f   :  { %335 = vrcp.f32 %v84_v43  ;;  %v121_v47 = vmul.f32 %v120_v45, %v103_v22  ;;  %v110_v56 = vmul.f32 %v109_v50, %v103_v22  ;;  %v96_v58 = vand.u32 2147483648, %v84_v43  ;;  %v21_v50 = vld [vmem:[%s478_s1 + $0x38] sm:$0xff] }
  0xa0   :  { %v94_v61 = vand.u32 2147483647, %v84_v43  ;;  %vm90_vm2 = vweird.f32 %v84_v43  ;;  %v74_v2 = vmul.f32 %v73_v59, %v405_v7 }
  0xa1   :  { %v122_v49 = vadd.f32 0.4994258, %v121_v47  ;;  %v111_v62 = vadd.f32 0.18741608, %v110_v56  ;;  %v97_v0 = vor.u32 1.1754944e-38, %v96_v58 }
  0xa2   :  { %vm95_vm4 = vcmp.eq.f32.partialorder %v94_v61, 8.507059e+37 }
  0xa3   :  { %v123_v51 = vmul.f32 %v122_v49, %v103_v22  ;;  %v112_v5 = vmul.f32 %v111_v62, %v103_v22 }
  0xa5   :  { %v336_v52 = vpop.eup %335  ;;  %v124_v55 = vadd.f32 1.0, %v123_v51  ;;  %v113_v14 = vadd.f32 1.1283791, %v112_v5 }
  0xa6   :  { %v86_v54 = vmul.f32 %v336_v52, %v84_v43  ;;  %vm91_vm1 = vweird.f32 %v336_v52  ;;  %v23_v43 = vld [vmem:[%s478_s1 + $0x48] sm:$0xff] }
  0xa7   :  { %337 = vrcp.f32 %v124_v55  ;;  %vm92_vm3 = vmor %vm90_vm2, %vm91_vm1  ;;  %v136_v11 = vand.u32 2147483648, %v124_v55  ;;  %v134_v17 = vand.u32 2147483647, %v124_v55  ;;  %vm130_vm6 = vweird.f32 %v124_v55  ;;  %284 = vmatpush.msra.mxu2 %v23_v43 }
  0xa8   :  { %v87_v57 = vsub.f32 1.0, %v86_v54  ;;  %v114_v22 = vmul.f32 %v113_v14, %v412_v16 }
  0xa9   :  { %v137_v7 = vor.u32 1.1754944e-38, %v136_v11  ;;  %vm135_vm9 = vcmp.eq.f32.partialorder %v134_v17, 8.507059e+37  ;;  %285 = vmatpush.msra.mxu2 %v22_v46 }
  0xaa   :  { %v88_v60 = vmul.f32 %v336_v52, %v87_v57 }
  0xab   :  { %286 = vmatpush.msra.mxu2 %v21_v50 }
  0xac   :  { %v89_v63 = vadd.f32 %v336_v52, %v88_v60 }
  0xad   :  { %v338_v1 = vpop.eup %337  ;;  %287 = vmatpush.msra.mxu2 %v20_v53 }
  0xae   :  { %v93_v3 = vsel %vm92_vm3, %v336_v52, %v89_v63  ;;  %v126_v8 = vmul.f32 %v338_v1, %v124_v55  ;;  %vm131_vm5 = vweird.f32 %v338_v1 }
  0xaf   :  { %v98_v4 = vsel %vm95_vm4, %v97_v0, %v93_v3  ;;  %vm132_vm8 = vmor %vm130_vm6, %vm131_vm5 }
  0xb0   :  { %v99_v9 = vmul.f32 %v98_v4, %v74_v2  ;;  %v127_v10 = vsub.f32 1.0, %v126_v8 }
  0xb2   :  { %v317_v12 = vclamps-f32 %v99_v9, 1.0  ;;  %v128_v15 = vmul.f32 %v338_v1, %v127_v10 }
  0xb4   :  { %v142_v19 = vadd.f32 1.0, %v317_v12  ;;  %v129_v20 = vadd.f32 %v338_v1, %v128_v15 }
  0xb6   :  { %v144_v21 = vmul.f32 %v142_v19, %v58_v18  ;;  %v133_v23 = vsel %vm132_vm8, %v338_v1, %v129_v20 }
  0xb7   :  { %v138_v24 = vsel %vm135_vm9, %v137_v7, %v133_v23 }
  0xb8   :  { %319 = vmatmul.msk.f32.vlgmr.msra.gmra.mxu1 %vm147_vm7, %v144_v21  ;;  %v139_v25 = vmul.f32 %v138_v24, %v114_v22 }
  0xba   :  { %v318_v26 = vclamps-f32 %v139_v25, 1.0 }
  0xbc   :  { %v143_v28 = vadd.f32 1.0, %v318_v26 }
  0xbe   :  { %v145_v6 = vmul.f32 %v143_v28, %v59_v27 }
  0xc0   :  { %320 = vmatmul.msk.f32.vlgmr.msra.gmra.mxu3 %vm147_vm7, %v145_v6 }
 0x135   :  { %v171_v30 = vpop.f32.mrf.mxu1 }
 0x136   :  { %v437_v31 = vadd.f32 %v333_v29, %v171_v30 }
 0x138   :  { %v440_v16 = vmul.f32 0.70710677, %v437_v31 }
 0x13a   :  { %v181_v32 = vmul.f32 %v440_v16, %v440_v16 }
 0x13c   :  { %v182_v33 = vmin.f32 %v181_v32, 16.0 }
 0x13e   :  { %v183_v34 = vmul.f32 2.1237322e-06, %v182_v33  ;;  %v194_v13 = vmul.f32 3.8918573e-05, %v182_v33 }
 0x140   :  { %v184_v35 = vadd.f32 0.00028619796, %v183_v34  ;;  %v195_v36 = vadd.f32 0.001143296, %v194_v13 }
 0x142   :  { %v185_v37 = vmul.f32 %v184_v35, %v182_v33  ;;  %v196_v38 = vmul.f32 %v195_v36, %v182_v33 }
 0x143   :  { %v174_v41 = vpop.f32.mrf.mxu3 }
 0x144   :  { %v186_v39 = vadd.f32 0.0036580483, %v185_v37  ;;  %v197_v40 = vadd.f32 0.014752088, %v196_v38  ;;  %v444_v42 = vadd.f32 %v333_v29, %v174_v41 }
 0x146   :  { %v198_v44 = vmul.f32 %v197_v40, %v182_v33  ;;  %v450_v45 = vmul.f32 0.70710677, %v444_v42  ;;  %v187_v47 = vmul.f32 %v186_v39, %v182_v33 }
 0x148   :  { %v199_v48 = vadd.f32 0.112945676, %v198_v44  ;;  %v221_v49 = vmul.f32 %v450_v45, %v450_v45  ;;  %v188_v54 = vadd.f32 0.05243302, %v187_v47 }
 0x14a   :  { %v200_v51 = vmul.f32 %v199_v48, %v182_v33  ;;  %v222_v52 = vmin.f32 %v221_v49, 16.0  ;;  %v189_v61 = vmul.f32 %v188_v54, %v182_v33  ;;  %v178_v49 = vmul.f32 0.5, %v444_v42 }
 0x14c   :  { %v201_v55 = vadd.f32 0.4994258, %v200_v51  ;;  %v223_v56 = vmul.f32 2.1237322e-06, %v222_v52  ;;  %v234_v57 = vmul.f32 3.8918573e-05, %v222_v52 }
 0x14d   :  { %v190_v2 = vadd.f32 0.18741608, %v189_v61 }
 0x14e   :  { %v202_v58 = vmul.f32 %v201_v55, %v182_v33  ;;  %v224_v59 = vadd.f32 0.00028619796, %v223_v56  ;;  %v235_v60 = vadd.f32 0.001143296, %v234_v57 }
 0x14f   :  { %v191_v9 = vmul.f32 %v190_v2, %v182_v33  ;;  %v177_v33 = vmul.f32 0.5, %v437_v31 }
 0x150   :  { %v203_v62 = vadd.f32 1.0, %v202_v58  ;;  %v225_v63 = vmul.f32 %v224_v59, %v222_v52  ;;  %v236_v0 = vmul.f32 %v235_v60, %v222_v52 }
 0x151   :  { %v192_v17 = vadd.f32 1.1283791, %v191_v9 }
 0x152   :  { %339 = vrcp.f32 %v203_v62  ;;  %v237_v1 = vadd.f32 0.014752088, %v236_v0  ;;  %v226_v3 = vadd.f32 0.0036580483, %v225_v63  ;;  %v215_v18 = vand.u32 2147483648, %v203_v62 }
 0x153   :  { %v213_v7 = vand.u32 2147483647, %v203_v62  ;;  %vm209_vm11 = vweird.f32 %v203_v62  ;;  %v193_v26 = vmul.f32 %v192_v17, %v440_v16 }
 0x154   :  { %v238_v4 = vmul.f32 %v237_v1, %v222_v52  ;;  %v227_v10 = vmul.f32 %v226_v3, %v222_v52  ;;  %v216_v24 = vor.u32 1.1754944e-38, %v215_v18 }
 0x155   :  { %vm214_vm13 = vcmp.eq.f32.partialorder %v213_v7, 8.507059e+37 }
 0x156   :  { %v239_v5 = vadd.f32 0.112945676, %v238_v4  ;;  %v228_v19 = vadd.f32 0.05243302, %v227_v10 }
 0x158   :  { %v340_v8 = vpop.eup %339  ;;  %v240_v12 = vmul.f32 %v239_v5, %v222_v52  ;;  %v229_v25 = vmul.f32 %v228_v19, %v222_v52 }
 0x159   :  { %v205_v11 = vmul.f32 %v340_v8, %v203_v62  ;;  %vm210_vm10 = vweird.f32 %v340_v8 }
 0x15a   :  { %v241_v15 = vadd.f32 0.4994258, %v240_v12  ;;  %vm211_vm12 = vmor %vm209_vm11, %vm210_vm10  ;;  %v230_v29 = vadd.f32 0.18741608, %v229_v25 }
 0x15b   :  { %v206_v14 = vsub.f32 1.0, %v205_v11 }
 0x15c   :  { %v242_v21 = vmul.f32 %v241_v15, %v222_v52  ;;  %v231_v13 = vmul.f32 %v230_v29, %v222_v52  ;;  %v334_v52 = vld [vmem:[%s478_s1 + $0x52] ss:$0 sm:$0xff] }
 0x15d   :  { %v207_v20 = vmul.f32 %v340_v8, %v206_v14 }
 0x15e   :  { %v243_v23 = vadd.f32 1.0, %v242_v21  ;;  %v232_v39 = vadd.f32 1.1283791, %v231_v13 }
 0x15f   :  { %v208_v22 = vadd.f32 %v340_v8, %v207_v20 }
 0x160   :  { %341 = vrcp.f32 %v243_v23  ;;  %v255_v38 = vand.u32 2147483648, %v243_v23  ;;  %v253_v40 = vand.u32 2147483647, %v243_v23  ;;  %vm249_vm15 = vweird.f32 %v243_v23 }
 0x161   :  { %v212_v27 = vsel %vm211_vm12, %v340_v8, %v208_v22  ;;  %v233_v44 = vmul.f32 %v232_v39, %v450_v45 }
 0x162   :  { %v217_v28 = vsel %vm214_vm13, %v216_v24, %v212_v27  ;;  %v256_v43 = vor.u32 1.1754944e-38, %v255_v38  ;;  %vm254_vm1 = vcmp.eq.f32.partialorder %v253_v40, 8.507059e+37 }
 0x163   :  { %v218_v6 = vmul.f32 %v217_v28, %v193_v26 }
 0x165   :  { %v321_v30 = vclamps-f32 %v218_v6, 1.0 }
 0x166   :  { %v342_v32 = vpop.eup %341 }
 0x167   :  { %v261_v34 = vadd.f32 1.0, %v321_v30  ;;  %v245_v35 = vmul.f32 %v342_v32, %v243_v23  ;;  %vm250_vm14 = vweird.f32 %v342_v32 }
 0x168   :  { %vm251_vm0 = vmor %vm249_vm15, %vm250_vm14 }
 0x169   :  { %v263_v36 = vmul.f32 %v261_v34, %v177_v33  ;;  %v246_v37 = vsub.f32 1.0, %v245_v35 }
 0x16b   :  { %323 = vmatmul.msk.f32.vlgmr.msra.gmra.mxu2 %vm147_vm7, %v263_v36  ;;  %v247_v16 = vmul.f32 %v342_v32, %v246_v37 }
 0x16d   :  { %v248_v41 = vadd.f32 %v342_v32, %v247_v16 }
 0x16f   :  { %v252_v46 = vsel %vm251_vm0, %v342_v32, %v248_v41 }
 0x170   :  { %v257_v31 = vsel %vm254_vm1, %v256_v43, %v252_v46 }
 0x171   :  { %v258_v47 = vmul.f32 %v257_v31, %v233_v44 }
 0x173   :  { %v322_v48 = vclamps-f32 %v258_v47, 1.0 }
 0x175   :  { %v262_v50 = vadd.f32 1.0, %v322_v48 }
 0x177   :  { %v264_v51 = vmul.f32 %v262_v50, %v178_v49 }
 0x179   :  { %324 = vmatmul.msk.f32.gmra.mxu2 %vm147_vm7, %v264_v51 }
 0x1ee   :  { %v289_v53 = vpop.f32.mrf.mxu2 }
 0x1ef   :  { %v290_v54 = vadd.f32 %v334_v52, %v289_v53 }
 0x1f1   :  { %295 = vst.msk [vmem:[#allocation2] sm:$0xff] %vm147_vm7, %v290_v54 }
 0x1fc   :  { %v292_v45 = vpop.f32.mrf.mxu2 }
 0x1fd   :  { %v293_v42 = vadd.f32 %v334_v52, %v292_v45 }
 0x1ff   :  { %296 = vst.msk [vmem:[#allocation2 + $0x8] sm:$0xff] %vm147_vm7, %v293_v42 }
 0x200   :  { %309 = dma.vmem_to_hbm [thread:$0]  %s302_s11, 256, %s304_s14, [#allocation3], %s370_s15, %s370_s15, %s371_s16  }
 0x201   :  { %367 = dma.done.wait [#allocation3], 256  }
 0x202   :  { %368 = vsyncadd [#allocation3], 4294967040 }
 0x203   :  { %314 = vsyncpa [#allocation3], 1 }

</bundles_post_ra>
